<compile_context>
chip_gen: v6e
topology: v6e:2x2x1
jax: 0.10.0
libtpu: 0.0.40
codegen_flags: <defaults>
</compile_context>

<pallas_src>
import functools

import jax
import jax.numpy as jnp
from jax.experimental import pallas as pl
from jax.experimental.pallas import tpu as pltpu


def _group_combine(v_c, member_cg):
    """(TB, C) -> (TB, G): sum of the channels belonging to each group."""
    return jnp.sum(v_c[:, :, None] * member_cg[None, :, :], axis=1)


def _group_broadcast(v_g, member_cg):
    """(TB, G) -> (TB, C): each channel picks its group's value."""
    return jnp.sum(v_g[:, None, :] * member_cg[None, :, :], axis=2)


def group_batchnorm_kernel(x_ref, w_ref, b_ref, o_ref, *, group_num, eps, hw_valid):
    # x_ref: (TB, C, HWp) block, lane-dense on the last axis.
    x = x_ref[...].astype(jnp.float32)                 # (TB, C, HWp)
    tb, c, hwp = x.shape
    cpg = c // group_num                               # channels per group
    n = cpg * hw_valid                                 # elements per group (unpadded)

    # (C, G) group-membership matrix from 2-D iota (no reshape, no int div).
    c_idx = jax.lax.broadcasted_iota(jnp.int32, (c, group_num), 0)
    g_idx = jax.lax.broadcasted_iota(jnp.int32, (c, group_num), 1)
    member_cg = jnp.logical_and(c_idx >= g_idx * cpg,
                                c_idx < (g_idx + 1) * cpg).astype(jnp.float32)

    # Pass 1: per-channel sums over the lane axis, group combine on tiny arrays.
    # (zero padding beyond hw_valid contributes 0 to the sum)
    s_c = jnp.sum(x, axis=2)                           # (TB, C)
    s_g = _group_combine(s_c, member_cg)               # (TB, G)
    mean_g = s_g * (1.0 / n)                           # (TB, G)
    mean_c = _group_broadcast(mean_g, member_cg)       # (TB, C)

    # Pass 2: unbiased variance, recomputing (x - mean) on the fly (no stored
    # tile-sized diff intermediate; it is reduced immediately).
    d = x - mean_c[:, :, None]
    d2 = d * d
    if hwp > hw_valid:                                 # static branch (padded lanes)
        lane = jax.lax.broadcasted_iota(jnp.int32, (tb, c, hwp), 2)
        d2 = jnp.where(lane < hw_valid, d2, 0.0)
    ss_c = jnp.sum(d2, axis=2)                         # (TB, C)
    ss_g = _group_combine(ss_c, member_cg)             # (TB, G)
    std_g = jnp.sqrt(ss_g * (1.0 / (n - 1)))           # torch.std default (ddof=1)
    inv_g = 1.0 / (std_g + eps)                        # eps on std, matches reference
    inv_c = _group_broadcast(inv_g, member_cg)         # (TB, C)

    # Fold normalize + affine into per-channel scale/shift (tiny arrays).
    w = w_ref[...].astype(jnp.float32)                 # (1, C)
    b = b_ref[...].astype(jnp.float32)                 # (1, C)
    scale_c = w * inv_c                                # (TB, C)
    shift_c = b - mean_c * scale_c                     # (TB, C)

    # Single big-tensor pass: out = x * scale + shift.
    o_ref[...] = (x * scale_c[:, :, None] + shift_c[:, :, None]).astype(o_ref.dtype)


def _vmem_capacity_bytes():
    try:
        return int(pltpu.get_tpu_info().vmem_capacity_bytes)
    except Exception:
        return 64 << 20  # conservative fallback (v7x per-TensorCore VMEM)


def group_batchnorm2d(x_nchw, weight, bias, *, group_num, eps=1e-10):
    """x_nchw: (B, C, H, W); weight/bias: (C, 1, 1) as in the PyTorch module."""
    B, C, H, W = x_nchw.shape
    # TODO(synk): support C % group_num != 0 (torch's view lets groups straddle
    # channel boundaries); the kernel layout assumes whole channels per group.
    assert C % group_num == 0, "kernel assumes channels divide evenly into groups"
    HW = H * W
    LANE = 128
    HW_pad = ((HW + LANE - 1) // LANE) * LANE          # lane-dense last dim

    x = x_nchw.reshape(B, C, HW)
    if HW_pad != HW:
        x = jnp.pad(x, ((0, 0), (0, 0), (0, HW_pad - HW)))
    w2d = weight.reshape(1, C)
    b2d = bias.reshape(1, C)

    itemsize = x.dtype.itemsize
    vmem_cap = _vmem_capacity_bytes()
    # Per-block budget: keep 2x(in+out) double buffers plus elementwise
    # intermediates well inside the per-generation VMEM (64 MiB on v7x,
    # 128 MiB on v5e/v6e).  ~8 MiB blocks on v5e/v6e, ~6 MiB on v7x.
    max_block_bytes = min(8 << 20, vmem_cap // 10)

    bytes_per_batch_row = C * HW_pad * itemsize
    tb = max(1, min(B, max_block_bytes // max(bytes_per_batch_row, 1)))
    if B >= 2:
        # At least 2 grid steps so both v7x TensorCores get work (the extra
        # ~0.35 us grid step is negligible on single-TC v5e/v6e).
        tb = min(tb, B // 2)
    tb = max(tb, 1)
    while B % tb:
        tb -= 1
    grid = (B // tb,)
    # TODO(synk): if a single batch row exceeds max_block_bytes (very large
    # C*H*W), additionally tile the HW axis instead of relying on vmem_limit.

    tile_bytes = tb * bytes_per_batch_row
    # 2x(in+out) double buffers + ~2 block-sized intermediates of headroom.
    vmem_limit = int(min(vmem_cap, max(32 << 20, 6 * tile_bytes + (2 << 20))))

    kernel = functools.partial(
        group_batchnorm_kernel, group_num=group_num, eps=eps, hw_valid=HW)

    out = pl.pallas_call(
        kernel,
        out_shape=jax.ShapeDtypeStruct((B, C, HW_pad), x_nchw.dtype),
        grid_spec=pltpu.PrefetchScalarGridSpec(
            num_scalar_prefetch=0,
            grid=grid,
            in_specs=[
                pl.BlockSpec((tb, C, HW_pad), lambda i: (i, 0, 0)),   # x
                pl.BlockSpec((1, C),          lambda i: (0, 0)),      # weight
                pl.BlockSpec((1, C),          lambda i: (0, 0)),      # bias
            ],
            out_specs=pl.BlockSpec((tb, C, HW_pad), lambda i: (i, 0, 0)),
        ),
        compiler_params=pltpu.CompilerParams(
            dimension_semantics=("parallel",),
            vmem_limit_bytes=vmem_limit),
    )(x, w2d, b2d)

    if HW_pad != HW:
        out = out[:, :, :HW]
    return out.reshape(B, C, H, W)


def group_batchnorm2d_ref(x, weight, bias, *, group_num, eps):
    """Pure-JAX reference matching the PyTorch forward (unbiased std)."""
    N, C, H, W = x.shape
    xg = x.reshape(N, group_num, -1)
    mean = jnp.mean(xg, axis=2, keepdims=True)
    std = jnp.std(xg, axis=2, keepdims=True, ddof=1)   # torch.std default: unbiased
    xg = (xg - mean) / (std + eps)
    xr = xg.reshape(N, C, H, W)
    return xr * weight + bias


if __name__ == "__main__":
    key = jax.random.PRNGKey(0)
    B, C, H, W = 2, 8, 16, 16
    group_num = 4          # module requires c_num >= group_num
    eps = 1e-10

    k_x, k_w = jax.random.split(key, 2)
    x = jax.random.normal(k_x, (B, C, H, W), dtype=jnp.float32)
    # Module init: weight ~ randn(C,1,1), bias = zeros(C,1,1).
    weight = jax.random.normal(k_w, (C, 1, 1), dtype=jnp.float32)
    bias = jnp.zeros((C, 1, 1), dtype=jnp.float32)

    out = group_batchnorm2d(x, weight, bias, group_num=group_num, eps=eps)
    out = jax.block_until_ready(out)

    ref = group_batchnorm2d_ref(x, weight, bias, group_num=group_num, eps=eps)
    assert out.shape == (B, C, H, W)
    assert jnp.allclose(out, ref, atol=1e-5, rtol=1e-5), "mismatch vs reference"

    print("KERNEL_OK")
</pallas_src>

<mosaic_0001>
module attributes {stable_mosaic.version = 11 : i64} {
  func.func @group_batchnorm_kernel(%arg0: i32, %arg1: memref<1x8x256xf32, #tpu.memory_space<vmem>>, %arg2: memref<1x8xf32, #tpu.memory_space<vmem>>, %arg3: memref<1x8xf32, #tpu.memory_space<vmem>>, %arg4: memref<1x8x256xf32, #tpu.memory_space<vmem>>) attributes {dimension_semantics = [#tpu.dimension_semantics<parallel>], iteration_bounds = array<i64: 2>, scalar_prefetch = 0 : i64, scratch_operands = 0 : i64, tpu.core_type = #tpu.core_type<tc>, window_params = [{transform_indices = @transform_0, window_bounds = array<i64: 1, 8, 256>}, {pipeline_mode = #tpu.pipeline_mode<synchronous>, transform_indices = @transform_1, window_bounds = array<i64: 1, 8>}, {pipeline_mode = #tpu.pipeline_mode<synchronous>, transform_indices = @transform_2, window_bounds = array<i64: 1, 8>}, {transform_indices = @transform_3, window_bounds = array<i64: 1, 8, 256>}]} {
    %c0 = arith.constant 0 : index
    %c0_0 = arith.constant 0 : index
    %c0_1 = arith.constant 0 : index
    %0 = vector.load %arg1[%c0, %c0_0, %c0_1] : memref<1x8x256xf32, #tpu.memory_space<vmem>>, vector<1x8x256xf32>
    %1 = tpu.iota {dimensions = array<i32: 0>} : vector<8x4xi32>
    %2 = tpu.iota {dimensions = array<i32: 1>} : vector<8x4xi32>
    %c2_i32 = arith.constant 2 : i32
    %3 = vector.broadcast %c2_i32 : i32 to vector<8x4xi32>
    %4 = arith.muli %2, %3 : vector<8x4xi32>
    %5 = arith.cmpi sge, %1, %4 : vector<8x4xi32>
    %c1_i32 = arith.constant 1 : i32
    %6 = vector.broadcast %c1_i32 : i32 to vector<8x4xi32>
    %7 = arith.addi %2, %6 : vector<8x4xi32>
    %c2_i32_2 = arith.constant 2 : i32
    %8 = vector.broadcast %c2_i32_2 : i32 to vector<8x4xi32>
    %9 = arith.muli %7, %8 : vector<8x4xi32>
    %10 = arith.cmpi slt, %1, %9 : vector<8x4xi32>
    %11 = arith.andi %5, %10 : vector<8x4xi1>
    %12 = arith.extui %11 : vector<8x4xi1> to vector<8x4xi32>
    %13 = arith.sitofp %12 : vector<8x4xi32> to vector<8x4xf32>
    %cst = arith.constant dense<0.000000e+00> : vector<1x8xf32>
    %14 = vector.multi_reduction <add>, %0, %cst [2] : vector<1x8x256xf32> to vector<1x8xf32>
    %15 = vector.shape_cast %14 : vector<1x8xf32> to vector<1x8x1xf32>
    %16 = vector.shape_cast %13 : vector<8x4xf32> to vector<1x8x4xf32>
    %17 = vector.broadcast %15 : vector<1x8x1xf32> to vector<1x8x4xf32>
    %18 = arith.mulf %17, %16 : vector<1x8x4xf32>
    %cst_3 = arith.constant dense<0.000000e+00> : vector<1x4xf32>
    %19 = vector.multi_reduction <add>, %18, %cst_3 [1] : vector<1x8x4xf32> to vector<1x4xf32>
    %cst_4 = arith.constant 0.001953125 : f32
    %20 = vector.broadcast %cst_4 : f32 to vector<1x4xf32>
    %21 = arith.mulf %19, %20 : vector<1x4xf32>
    %22 = vector.shape_cast %21 : vector<1x4xf32> to vector<1x1x4xf32>
    %23 = vector.shape_cast %13 : vector<8x4xf32> to vector<1x8x4xf32>
    %24 = vector.broadcast %22 : vector<1x1x4xf32> to vector<1x8x4xf32>
    %25 = arith.mulf %24, %23 : vector<1x8x4xf32>
    %cst_5 = arith.constant dense<0.000000e+00> : vector<1x8xf32>
    %26 = vector.multi_reduction <add>, %25, %cst_5 [2] : vector<1x8x4xf32> to vector<1x8xf32>
    %27 = vector.shape_cast %26 : vector<1x8xf32> to vector<1x8x1xf32>
    %28 = vector.broadcast %27 : vector<1x8x1xf32> to vector<1x8x256xf32>
    %29 = arith.subf %0, %28 : vector<1x8x256xf32>
    %30 = arith.mulf %29, %29 : vector<1x8x256xf32>
    %cst_6 = arith.constant dense<0.000000e+00> : vector<1x8xf32>
    %31 = vector.multi_reduction <add>, %30, %cst_6 [2] : vector<1x8x256xf32> to vector<1x8xf32>
    %32 = vector.shape_cast %31 : vector<1x8xf32> to vector<1x8x1xf32>
    %33 = vector.shape_cast %13 : vector<8x4xf32> to vector<1x8x4xf32>
    %34 = vector.broadcast %32 : vector<1x8x1xf32> to vector<1x8x4xf32>
    %35 = arith.mulf %34, %33 : vector<1x8x4xf32>
    %cst_7 = arith.constant dense<0.000000e+00> : vector<1x4xf32>
    %36 = vector.multi_reduction <add>, %35, %cst_7 [1] : vector<1x8x4xf32> to vector<1x4xf32>
    %cst_8 = arith.constant 0.00195694715 : f32
    %37 = vector.broadcast %cst_8 : f32 to vector<1x4xf32>
    %38 = arith.mulf %36, %37 : vector<1x4xf32>
    %39 = math.sqrt %38 : vector<1x4xf32>
    %cst_9 = arith.constant 1.000000e-10 : f32
    %40 = vector.broadcast %cst_9 : f32 to vector<1x4xf32>
    %41 = arith.addf %39, %40 : vector<1x4xf32>
    %cst_10 = arith.constant 1.000000e+00 : f32
    %42 = vector.broadcast %cst_10 : f32 to vector<1x4xf32>
    %43 = arith.divf %42, %41 : vector<1x4xf32>
    %44 = vector.shape_cast %43 : vector<1x4xf32> to vector<1x1x4xf32>
    %45 = vector.shape_cast %13 : vector<8x4xf32> to vector<1x8x4xf32>
    %46 = vector.broadcast %44 : vector<1x1x4xf32> to vector<1x8x4xf32>
    %47 = arith.mulf %46, %45 : vector<1x8x4xf32>
    %cst_11 = arith.constant dense<0.000000e+00> : vector<1x8xf32>
    %48 = vector.multi_reduction <add>, %47, %cst_11 [2] : vector<1x8x4xf32> to vector<1x8xf32>
    %c0_12 = arith.constant 0 : index
    %c0_13 = arith.constant 0 : index
    %49 = vector.load %arg2[%c0_12, %c0_13] : memref<1x8xf32, #tpu.memory_space<vmem>>, vector<1x8xf32>
    %c0_14 = arith.constant 0 : index
    %c0_15 = arith.constant 0 : index
    %50 = vector.load %arg3[%c0_14, %c0_15] : memref<1x8xf32, #tpu.memory_space<vmem>>, vector<1x8xf32>
    %51 = arith.mulf %49, %48 : vector<1x8xf32>
    %52 = arith.mulf %26, %51 : vector<1x8xf32>
    %53 = arith.subf %50, %52 : vector<1x8xf32>
    %54 = vector.shape_cast %51 : vector<1x8xf32> to vector<1x8x1xf32>
    %55 = vector.broadcast %54 : vector<1x8x1xf32> to vector<1x8x256xf32>
    %56 = arith.mulf %0, %55 : vector<1x8x256xf32>
    %57 = vector.shape_cast %53 : vector<1x8xf32> to vector<1x8x1xf32>
    %58 = vector.broadcast %57 : vector<1x8x1xf32> to vector<1x8x256xf32>
    %59 = arith.addf %56, %58 : vector<1x8x256xf32>
    %c0_16 = arith.constant 0 : index
    %c0_17 = arith.constant 0 : index
    %c0_18 = arith.constant 0 : index
    %60 = vector.load %arg4[%c0_16, %c0_17, %c0_18] : memref<1x8x256xf32, #tpu.memory_space<vmem>>, vector<1x8x256xf32>
    tpu.vector_store %arg4[%c0_16, %c0_17, %c0_18], %59 {strides = array<i32>} : memref<1x8x256xf32, #tpu.memory_space<vmem>>, vector<1x8x256xf32>,
    return
  }
  func.func @transform_0(%arg0: i32) -> (i32, i32, i32) {
    %c0_i32 = arith.constant 0 : i32
    %c0_i32_0 = arith.constant 0 : i32
    %c0_i32_1 = arith.constant 0 : i32
    return %arg0, %c0_i32, %c0_i32_0 : i32, i32, i32
  }
  func.func @transform_1(%arg0: i32) -> (i32, i32) {
    %c0_i32 = arith.constant 0 : i32
    %c0_i32_0 = arith.constant 0 : i32
    %c0_i32_1 = arith.constant 0 : i32
    return %c0_i32, %c0_i32_0 : i32, i32
  }
  func.func @transform_2(%arg0: i32) -> (i32, i32) {
    %c0_i32 = arith.constant 0 : i32
    %c0_i32_0 = arith.constant 0 : i32
    %c0_i32_1 = arith.constant 0 : i32
    return %c0_i32, %c0_i32_0 : i32, i32
  }
  func.func @transform_3(%arg0: i32) -> (i32, i32, i32) {
    %c0_i32 = arith.constant 0 : i32
    %c0_i32_0 = arith.constant 0 : i32
    %c0_i32_1 = arith.constant 0 : i32
    return %arg0, %c0_i32, %c0_i32_0 : i32, i32, i32
  }
}

</mosaic_0001>

<bundles_post_ra>
// kernel: tpu_custom_call.1
= control target key start
LH: loop header
LB: loop body
LE: loop exit
PB: predicated region body
PF: predicated region fallthrough
CT: control target
= control target key end

     0   :  { %8 = vsyncpa [#allocation3], 0  ;;  %s1009_s0 = inlined_call_operand.hbm [shape: f32[2,8,256], index: 0, kind: input, shape index: {}]   ;;  %s1010_s1 = inlined_call_operand.vmem [shape: f32[1,8], index: 1, kind: input, shape index: {}]   ;;  %s1011_s2 = inlined_call_operand.vmem [shape: f32[1,8], index: 2, kind: input, shape index: {}]   ;;  %s1012_s3 = inlined_call_operand.hbm [shape: f32[2,8,256], index: 3, kind: output, shape index: {}]  }
   0x1   :  { %10 = vsyncpa [#allocation3 + $0x1], 0 }
   0x2   :  { %11 = vsyncpa [#allocation4], 0 }
   0x3   :  { %13 = vsyncpa [#allocation4 + $0x1], 0  ;;  %s785_s12 = smov 0   ;;  %s787_s13 = smov 0  }
   0x4   :  { %s789_s14 = smov 0   ;;  %s791_s15 = smov 0  }
   0x5 LB: > { %s806_s16 = sadd.s32 4294967295, %s758_s15   ;;  %s592_s17 = sadd.s32 4294967294, %s758_s15   ;;  %s758_s15 = sphi %s791_s15, %s1029_s15   ;;  %s754_s14 = sphi %s789_s14, %s1028_s14   ;;  %s750_s13 = sphi %s787_s13, %s1027_s13   ;;  %s746_s12 = sphi %s785_s12, %s1026_s12  }
   0x6   : > { %s810_s18 = sadd.s32 1, %s758_s15   ;;  %s26_s19 = sadd.s32 1, %s754_s14 }
   0x7   : > { %s23_s20 = ssub.s32 %s758_s15, %s810_s18  ;;  %p33_p0 = scmp.ne.s32.totalorder %s754_s14, %s750_s13 }
   0x8   : > { %p24_p1 = scmp.eq.s32.totalorder %s23_s20, 0  ;;  %p34_p2 = scmp.eq.s32.totalorder %s758_s15, 0 }
   0x9   : > { %p39_p3 = scmp.ne.s32.totalorder %s750_s13, %s746_s12  ;;  %p40_p4 = scmp.eq.s32.totalorder %s806_s16, 0 }
   0xa   : > { %s822_s21 = scalar_select %p24_p1, %s754_s14, %s26_s19  }
   0xb   : > { %p824_p5 = por %p34_p2, %p33_p0  ;;  %p828_p6 = por %p40_p4, %p39_p3 }
   0xc   : > { %p105_p7 = scmp.eq.s32.totalorder %s806_s16, 1  ;;  %p111_p8 = scmp.eq.s32.totalorder %s592_s17, 1 }
   0xd   : > { %s1016_s23 = scalar_select %p828_p6, 1, 0 }
   0xe   : > { %p623_p10 = scmp.lt.s32.totalorder %s758_s15, 2  ;;  %p835_p11 = por %p105_p7, %p33_p0 }
   0xf   : > { %p839_p12 = por %p111_p8, %p39_p3  ;;  %s137_s26 = sand.u32 1, %s754_s14  }
  0x10   : > { %s1017_s24 = scalar_select %p835_p11, 1, 0 }
  0x11   : > { %s1018_s25 = scalar_select %p839_p12, 1, 0 }
  0x12   : > { %s609_s27 = sshll.u32 %s758_s15, 8  ;;  %s595_s28 = sshll.u32 %s137_s26, 4 }
  0x13   : > { %s848_s4 = scalar_lea.hbm %s1009_s0, %s609_s27  ;;  %s141_s5 = scalar_lea.vmem [#allocation2], %s595_s28 }
  0x14   : > { %s149_s6 = sshll.u32 %s141_s5, 4  ;;  %p852_p13 = pnand %p623_p10, %p824_p5  ;;  %s856_s6 = int_to_ptr.vmem [resolvable:$true] %s149_s6 }
  0x15   : > { %s138_s8 = scalar_lea.sflag [#allocation3], %s137_s26  ;;  %s666_s9 = scalar_lea.hbm %s848_s4, 256 }
  0x16   : > { %p667_p2 = scmp.ne.s32.totalorder %s848_s4, %s666_s9  ;;  %p668_p3 = pneg %p852_p13 }
  0x17   : > { %s671_s17 = scalar_lea.hbm %s1009_s0, 512  ;;  %p672_p5 = scmp.lt.s32.totalorder %s848_s4, %s1009_s0 }
  0x18   : > { %p669_p4 = pnand %p668_p3, %p667_p2  ;;  %p673_p8 = scmp.lt.s32.totalorder %s671_s17, %s666_s9 }
  0x1a   : > { %p670_p7 = pneg %p669_p4  ;;  %p674_p10 = por %p673_p8, %p672_p5 }
  0x1c   : > { %p675_p9 = pnand %p674_p10, %p670_p7 }
  0x1e   : > { %678 = shalt.err (!%p675_p9)
}
  0x1f   : > { %s679_s22 = scalar_lea.vmem %s856_s6, 256  ;;  %s760_s26 = smov [#allocation2]  }
  0x20   : > { %p680_p0 = scmp.ne.s32.totalorder %s856_s6, %s679_s22  ;;  %s684_s27 = sshll.u32 %s760_s26, 4  ;;  %s685_s27 = int_to_ptr.vmem [resolvable:$false] %s684_s27 }
  0x21   : > { %s686_s28 = scalar_lea.vmem %s685_s27, 512  ;;  %p687_p4 = scmp.lt.s32.totalorder %s856_s6, %s685_s27 }
  0x22   : > { %p682_p1 = pnand %p680_p0, %p668_p3  ;;  %p688_p12 = scmp.lt.s32.totalorder %s686_s28, %s679_s22 }
  0x24   : > { %p683_p2 = pneg %p682_p1  ;;  %p689_p11 = por %p688_p12, %p687_p4 }
  0x26   : > { %p690_p6 = pnand %p689_p11, %p683_p2 }
  0x28   : > { %693 = shalt.err (!%p690_p6)
}
  0x29   : > { %618 = dma.hbm_to_vmem [thread:$0]  (!%p852_p13), %s848_s4, 256, %s856_s6, %s138_s8  }
  0x2a   : > { %p1020_p9 = scmp.lt.s32.totalorder %s758_s15, 3  ;;  %p1021_p7 = scmp.ge.s32.totalorder %s758_s15, 1 }
  0x2c   : > { %p155_p0 = pnand %p1021_p7, %p1020_p9 }
  0x2d   : > { %s883_s29 = sand.u32 (!%p155_p0), 1, %s750_s13   ;;  %p1022_p6 = scmp.ne.s32.totalorder (!%p155_p0), %s1016_s23, 0 }
  0x2e   : > { %158 = sbr.rel (%p155_p0) target bundleno = 1233 (0x4d1), region = 32  ;;  %s599_s30 = sshll.u32 (!%p155_p0), %s883_s29, 4 }
  0x2f   : > { %s161_s5 = scalar_lea.sflag (!%p155_p0), [#allocation3], %s883_s29  ;;  %s164_s7 = scalar_lea.vmem (!%p155_p0), [#allocation2], %s599_s30 }
  0x33   : > { %737 = dma.done.wait (%p1022_p6), %s161_s5, 256  }
  0x34   : > { %739 = vsyncadd (%p1022_p6), %s161_s5, 4294967040  ;;  %v893_v0 = vld [vmem:[%s164_s7] sm:$0xff]  ;;  %v895_v1 = vld [vmem:[%s164_s7 + $0x8] sm:$0xff]  ;;  %v189_v3 = vlaneseq  ;;  %v761_v9 = vmov 0.0   ;;  %vm205_vm3 = vcmask 31744   ;;  %v762_v48 = vmov 0  }
  0x35   : > { %v201_v2 = vadd.f32 %v895_v1, %v893_v0  ;;  %660 = vset.pattern.permute.xlu0 %v762_v48  ;;  %661 = vset.pattern.permute.xlu1 %v762_v48  ;;  %v763_v49 = vmov 1966171168   ;;  %s610_s9 = sshll.u32 %s806_s16, 8  ;;  %s186_s10 = scalar_lea.vmem [#allocation5], %s599_s30 }
  0x36   : > { %v899_v4 = vand.u32 127, %v189_v3  ;;  %v902_v6 = vshrl.u32 %v189_v3, 7  ;;  %v288_v50 = vunpack.c.l.s4 %v763_v49  ;;  %s522_s11 = sshll.u32 %s186_s10, 4  ;;  %s972_s20 = scalar_lea.hbm %s1012_s3, %s610_s9  ;;  %s523_s11 = int_to_ptr.vmem [resolvable:$true] %s522_s11 }
  0x37   : > { %202 = vadd.xlane.f32.xlu0 %v201_v2  ;;  %s508_s22 = scalar_lea.sflag [#allocation4], %s883_s29  ;;  %s694_s16 = scalar_lea.vmem %s523_s11, 256 }
  0x38   : > { %v195_v5 = vadd.s32 1, %v899_v4  ;;  %v193_v7 = vmul.u32 2, %v899_v4  ;;  %v289_v51 = vunpack.c.0.s8 %v288_v50  ;;  %v918_v52 = vsub.s32 0, %v902_v6  ;;  %p695_p11 = scmp.ne.s32.totalorder %s523_s11, %s694_s16  ;;  %p1023_p12 = scmp.ne.s32.totalorder %s1017_s24, 0 }
  0x39   : > { %v257_v53 = vsub.s32 1, %v902_v6  ;;  %v261_v54 = vsub.s32 2, %v902_v6  ;;  %v265_v55 = vsub.s32 3, %v902_v6  ;;  %v269_v56 = vsub.s32 4, %v902_v6  ;;  %s764_s26 = smov [#allocation5]  }
  0x3a   : > { %v196_v8 = vmul.u32 2, %v195_v5  ;;  %vm194_vm0 = vcmp.ge.s32.totalorder %v902_v6, %v193_v7  ;;  %v273_v57 = vsub.s32 5, %v902_v6  ;;  %v277_v58 = vsub.s32 6, %v902_v6  ;;  %p696_p13 = pnand %p695_p11, %p1023_p12  ;;  %s698_s27 = sshll.u32 %s764_s26, 4  ;;  %s699_s27 = int_to_ptr.vmem [resolvable:$false] %s698_s27 }
  0x3b   : > { %v281_v59 = vsub.s32 7, %v902_v6  ;;  %v928_v60 = vsub.s32 %v289_v51, %v902_v6  ;;  %s700_s28 = scalar_lea.vmem %s699_s27, 512  ;;  %p701_p3 = scmp.lt.s32.totalorder %s523_s11, %s699_s27 }
  0x3c   : > { %vm197_vm1 = vcmp.lt.s32.totalorder %v902_v6, %v196_v8  ;;  %p697_p1 = pneg %p696_p13  ;;  %p702_p5 = scmp.lt.s32.totalorder %s700_s28, %s694_s16 }
  0x3d   : > { %vm198_vm2 = vmand %vm194_vm0, %vm197_vm1 }
  0x3e   : > { %v601_v10 = vsel %vm198_vm2, 1.0, %v761_v9  ;;  %p703_p8 = por %p702_p5, %p701_p3 }
  0x40   : > { %p704_p10 = pnand %p703_p8, %p697_p1 }
  0xc0   : > { %v203_v11 = vpop.xlane.xlu0 %202 }
  0xc1   : > { %v204_v12 = vmul.f32 %v601_v10, %v203_v11 }
  0xc3   : > { %v206_v13 = vsel %vm205_vm3, %v204_v12, 0.0 }
  0xc4   : > { %v207_v14 = vrot.slane %v206_v13, 4 }
  0xc6   : > { %v208_v15 = vadd.f32 %v207_v14, %v206_v13 }
  0xc8   : > { %v209_v16 = vrot.slane %v208_v15, 2 }
  0xca   : > { %v210_v17 = vadd.f32 %v209_v16, %v208_v15 }
  0xcc   : > { %v211_v18 = vrot.slane %v210_v17, 1 }
  0xce   : > { %v212_v19 = vadd.f32 %v211_v18, %v210_v17 }
  0xd0   : > { %v213_v20 = vmul.f32 0.001953125, %v212_v19 }
  0xd2   : > { %v214_v21 = vmul.f32 %v601_v10, %v213_v20 }
  0xd4   : > { %v215_v22 = vsel %vm205_vm3, %v214_v21, 0.0 }
  0xd5   : > { %216 = vadd.xlane.f32.xlu0 %v215_v22 }
 0x15e   : > { %v909_v23 = vpop.xlane.xlu0 %216 }
 0x15f   : > { %v218_v24 = vsub.f32 %v893_v0, %v909_v23  ;;  %v219_v25 = vsub.f32 %v895_v1, %v909_v23 }
 0x161   : > { %v220_v26 = vmul.f32 %v218_v24, %v218_v24  ;;  %v221_v27 = vmul.f32 %v219_v25, %v219_v25  ;;  %v337_v24 = vsub.s32 %v899_v4, %v902_v6 }
 0x163   : > { %v222_v28 = vadd.f32 %v221_v27, %v220_v26 }
 0x165   : > { %223 = vadd.xlane.f32.xlu1 %v222_v28  ;;  %v248_v28 = vld [vmem:[%s1010_s1] sm:$0x1] }
 0x1ee   : > { %v224_v29 = vpop.xlane.xlu1 %223 }
 0x1ef   : > { %v225_v30 = vmul.f32 %v601_v10, %v224_v29 }
 0x1f1   : > { %v226_v31 = vsel %vm205_vm3, %v225_v30, 0.0 }
 0x1f2   : > { %v227_v32 = vrot.slane %v226_v31, 4 }
 0x1f4   : > { %v228_v33 = vadd.f32 %v227_v32, %v226_v31 }
 0x1f6   : > { %v229_v34 = vrot.slane %v228_v33, 2 }
 0x1f8   : > { %v230_v35 = vadd.f32 %v229_v34, %v228_v33 }
 0x1fa   : > { %v231_v36 = vrot.slane %v230_v35, 1 }
 0x1fc   : > { %v232_v37 = vadd.f32 %v231_v36, %v230_v35 }
 0x1fe   : > { %v233_v38 = vmul.f32 0.0019569471, %v232_v37 }
 0x200   : > { %662 = vrsqrt.f32 %v233_v38  ;;  %vm236_vm4 = vcmp.eq.f32.partialorder %v233_v38, inf  ;;  %v239_v41 = vand.u32 2147483648, %v233_v38  ;;  %vm238_vm5 = vcmp.eq.f32.partialorder %v233_v38, 0.0 }
 0x20d   : > { %v663_v39 = vpop.eup %662 }
 0x20e   : > { %v235_v40 = vmul.f32 %v663_v39, %v233_v38 }
 0x210   : > { %v237_v42 = vsel %vm236_vm4, %v233_v38, %v235_v40 }
 0x211   : > { %v240_v43 = vsel %vm238_vm5, %v239_v41, %v237_v42 }
 0x212   : > { %v241_v44 = vadd.f32 1e-10, %v240_v43 }
 0x214   : > { %664 = vrcp.f32 %v241_v44 }
 0x221   : > { %v665_v45 = vpop.eup %664 }
 0x222   : > { %v244_v46 = vmul.f32 %v665_v45, %v601_v10 }
 0x224   : > { %v245_v47 = vsel %vm205_vm3, %v244_v46, 0.0 }
 0x225   : > { %246 = vadd.xlane.f32.xlu1 %v245_v47 }
 0x2ae   : > { %v247_v61 = vpop.xlane.xlu1 %246 }
 0x2af   : > { %v254_v62 = vrot.slane %v247_v61, %v918_v52  ;;  %v258_v63 = vrot.slane %v247_v61, %v257_v53  ;;  %v262_v2 = vrot.slane %v247_v61, %v261_v54  ;;  %v266_v3 = vrot.slane %v247_v61, %v265_v55 }
 0x2b0   : > { %v270_v5 = vrot.slane %v247_v61, %v269_v56  ;;  %v274_v7 = vrot.slane %v247_v61, %v273_v57  ;;  %v278_v8 = vrot.slane %v247_v61, %v277_v58  ;;  %v282_v9 = vrot.slane %v247_v61, %v281_v59  ;;  %v249_v57 = vld [vmem:[%s1011_s2] sm:$0x1] }
 0x2b1   : > { %v283_v10 = vcombine.low %v254_v62, %v258_v63  ;;  %v284_v11 = vcombine.low %v262_v2, %v266_v3 }
 0x2b2   : > { %v285_v12 = vcombine.low %v270_v5, %v274_v7  ;;  %v286_v13 = vcombine.low %v278_v8, %v282_v9 }
 0x2b3   : > { %v293_v14 = vrot.slane %v283_v10, %v928_v60  ;;  %v300_v15 = vrot.slane %v284_v11, %v928_v60 }
 0x2b4   : > { %v307_v16 = vrot.slane %v285_v12, %v928_v60  ;;  %v314_v17 = vrot.slane %v286_v13, %v928_v60 }
 0x2b5   : > { %v315_v18 = vcombine.low %v293_v14, %v300_v15 }
 0x2b6   : > { %v316_v19 = vcombine.low %v307_v16, %v314_v17 }
 0x2b7   : > { %v323_v20 = vrot.slane %v315_v18, %v928_v60 }
 0x2b8   : > { %v330_v21 = vrot.slane %v316_v19, %v928_v60 }
 0x2ba   : > { %v331_v22 = vcombine.low %v323_v20, %v330_v21 }
 0x2bc   : > { %333 = vperm.xlu0 %660, %v331_v22  }
 0x337   : > { %v334_v25 = vpop.permute.xlu0 %333 }
 0x338   : > { %v338_v26 = vrot.slane %v334_v25, %v337_v24 }
 0x33a   : > { %v345_v27 = vrot.slane %v338_v26, %v928_v60 }
 0x33c   : > { %v352_v29 = vrot.slane %v345_v27, %v928_v60 }
 0x33e   : > { %v354_v30 = vmul.f32 %v352_v29, %v248_v28 }
 0x340   : > { %v359_v31 = vrot.slane %v354_v30, %v918_v52 }
 0x342   : > { %361 = vbcast.lane.b32.xlu1 %v359_v31, 256 }
 0x3b4   : > { %v362_v32 = vpop.permute.xlu1 %361 }
 0x3b5   : > { %v364_v33 = vmul.f32 %v362_v32, %v909_v23 }
 0x3b7   : > { %v366_v34 = vcombine.high %v364_v33, %v364_v33  ;;  %v373_v4 = vrot.slane %v364_v33, %v928_v60 }
 0x3b9   : > { %v380_v6 = vrot.slane %v366_v34, %v928_v60  ;;  %v381_v35 = vcombine.high %v373_v4, %v373_v4  ;;  %v389_v37 = vrot.slane %v373_v4, %v928_v60 }
 0x3bb   : > { %v382_v36 = vcombine.high %v380_v6, %v380_v6  ;;  %v403_v38 = vrot.slane %v381_v35, %v928_v60  ;;  %v396_v39 = vrot.slane %v380_v6, %v928_v60 }
 0x3bd   : > { %v410_v40 = vrot.slane %v382_v36, %v928_v60  ;;  %v415_v41 = vcombine.low %v389_v37, %v403_v38  ;;  %v602_v42 = vcombine.high %v389_v37, %v403_v38 }
 0x3bf   : > { %v417_v43 = vcombine.low %v396_v39, %v410_v40  ;;  %v603_v44 = vcombine.high %v396_v39, %v410_v40  ;;  %v425_v23 = vrot.slane %v415_v41, %v928_v60  ;;  %v432_v45 = vrot.slane %v602_v42, %v928_v60 }
 0x3c1   : > { %v439_v46 = vrot.slane %v417_v43, %v928_v60  ;;  %v446_v47 = vrot.slane %v603_v44, %v928_v60  ;;  %v447_v48 = vcombine.low %v425_v23, %v432_v45 }
 0x3c3   : > { %v448_v49 = vcombine.low %v439_v46, %v446_v47  ;;  %v455_v50 = vrot.slane %v447_v48, %v928_v60 }
 0x3c5   : > { %v462_v51 = vrot.slane %v448_v49, %v928_v60 }
 0x3c7   : > { %v463_v53 = vcombine.low %v455_v50, %v462_v51 }
 0x3c9   : > { %465 = vperm.xlu1 %661, %v463_v53  }
 0x3cd   : > { %492 = vbcast.lane.b32.xlu1 %v359_v31, 256 }
 0x444   : > { %v466_v54 = vpop.permute.xlu1 %465 }
 0x445   : > { %v470_v55 = vrot.slane %v466_v54, %v337_v24 }
 0x447   : > { %v477_v56 = vrot.slane %v470_v55, %v928_v60 }
 0x448   : > { %v493_v62 = vpop.permute.xlu1 %492 }
 0x449   : > { %v484_v58 = vrot.slane %v477_v56, %v928_v60  ;;  %v494_v63 = vmul.f32 %v493_v62, %v893_v0  ;;  %v495_v2 = vmul.f32 %v493_v62, %v895_v1 }
 0x44b   : > { %v486_v59 = vsub.f32 %v249_v57, %v484_v58 }
 0x44d   : > { %v499_v61 = vrot.slane %v486_v59, %v918_v52 }
 0x44f   : > { %501 = vbcast.lane.b32.xlu1 %v499_v61, 256 }
 0x4c1   : > { %v502_v3 = vpop.permute.xlu1 %501 }
 0x4c2   : > { %v503_v5 = vadd.f32 %v502_v3, %v494_v63  ;;  %v504_v7 = vadd.f32 %v502_v3, %v495_v2 }
 0x4c4   : > { %505 = vst [vmem:[%s186_s10] sm:$0xff] %v503_v5  ;;  %506 = vst [vmem:[%s186_s10 + $0x8] sm:$0xff] %v504_v7 }
 0x4c5   : > { %707 = shalt.err (!%p704_p10)
}
 0x4c6   : > { %s708_s30 = scalar_lea.hbm %s972_s20, 256  ;;  %s712_s7 = scalar_lea.hbm %s1012_s3, 512 }
 0x4c7   : > { %p709_p2 = scmp.ne.s32.totalorder %s972_s20, %s708_s30  ;;  %p713_p7 = scmp.lt.s32.totalorder %s972_s20, %s1012_s3 }
 0x4c8   : > { %p714_p0 = scmp.lt.s32.totalorder %s712_s7, %s708_s30 }
 0x4c9   : > { %p710_p4 = pnand %p709_p2, %p1023_p12 }
 0x4ca   : > { %p715_p6 = por %p714_p0, %p713_p7 }
 0x4cb   : > { %p711_p9 = pneg %p710_p4 }
 0x4cd   : > { %p716_p11 = pnand %p715_p6, %p711_p9 }
 0x4cf   : > { %719 = shalt.err (!%p716_p11)
}
 0x4d0   : > { %613 = dma.vmem_to_hbm [thread:$0]  (%p1023_p12), %s523_s11, 256, %s972_s20, %s508_s22  }
 0x4d1 PF: > { %s534_s6 = sand.u32 1, %s746_s12   ;;  %p1024_p13 = scmp.ne.s32.totalorder %s1018_s25, 0 }
 0x4d2   : > { %p1025_p1 = scmp.ge.s32.totalorder %s758_s15, 2  ;;  %s535_s8 = scalar_lea.sflag [#allocation4], %s534_s6 }
 0x4d4   : > { %p620_p3 = pnand %p1025_p1, %p1024_p13 }
 0x4d6   : > { %p621_p5 = pneg %p620_p3 }
 0x4d8   : > { %741 = dma.done.wait (%p621_p5), %s535_s8, 256  }
 0x4d9   : > { %743 = vsyncadd (%p621_p5), %s535_s8, 4294967040  ;;  %p16_p8 = scmp.ge.s32.totalorder %s810_s18, 4   ;;  %s1026_s12 = smov %s750_s13 }
 0x4da   : > { %s1027_s13 = smov %s754_s14  ;;  %s1028_s14 = smov %s822_s21 }
 0x4db   : > { %s1029_s15 = smov %s810_s18  ;;  %18 = sbr.rel (!%p16_p8) target bundleno = 5 (0x5), region = 77 }
 0x4e0   :  { %540 = vsyncpa [#allocation3], 1 }
 0x4e1   :  { %542 = vsyncpa [#allocation3 + $0x1], 1 }
 0x4e2   :  { %543 = vsyncpa [#allocation4], 1 }
 0x4e3   :  { %545 = vsyncpa [#allocation4 + $0x1], 1 }

</bundles_post_ra>
